<compile_context>
chip_gen: v5e
topology: v5e:2x2
jax: 0.10.0
libtpu: 0.0.40
codegen_flags: <defaults>
</compile_context>

<pallas_src>
import math

import jax
import jax.numpy as jnp
from jax.experimental import pallas as pl
from jax.experimental.pallas import tpu as pltpu


def _silu(x):
    return x * jax.nn.sigmoid(x)


def _round_up(x, m):
    return ((x + m - 1) // m) * m


def _choose_batch_tile(bp, tile_b, gran):
    """Largest multiple-of-`gran` divisor of `bp` that is <= tile_b, with a mild
    preference for an even number of tiles (megacore sharding on v7x)."""
    limit = min(max(tile_b, gran), bp)
    cands = [d for d in range(gran, limit + 1, gran) if bp % d == 0]
    if not cands:
        return gran
    best = cands[-1]
    even = [d for d in cands if (bp // d) % 2 == 0]
    # Prefer an even tile count, but never shrink the tile by more than 2x for it.
    if even and even[-1] * 2 >= best:
        return even[-1]
    return best


def phi_mlp_kernel(x_ref, w1_ref, b1_ref, w2_ref, b2_ref, w3_ref, b3_ref, o_ref):
    x = x_ref[...]                      # (tb, 2)  f32
    w1 = w1_ref[...]                    # (2, H)   f32

    # Layer 1: contraction dim is 2 -> two VPU broadcast-FMAs instead of a padded MXU op.
    h1 = x[:, 0:1] * w1[0:1, :] + x[:, 1:2] * w1[1:2, :] + b1_ref[...]
    h1 = _silu(h1)                      # (tb, H)  f32

    # w2/w3 arrive already in the desired MXU input dtype (f32 or bf16, cast once in
    # the wrapper); accumulate in f32 either way.
    dot_dtype = w2_ref.dtype

    h2 = jnp.dot(h1.astype(dot_dtype), w2_ref[...],
                 preferred_element_type=jnp.float32) + b2_ref[...]
    h2 = _silu(h2)                      # (tb, H)  f32

    out = jnp.dot(h2.astype(dot_dtype), w3_ref[...],
                  preferred_element_type=jnp.float32) + b3_ref[...]
    # E is a multiple of 128 -> lane-dense, unmasked stores.
    o_ref[...] = out.astype(o_ref.dtype)


def phi_embedding_cosmo(phi, w1, b1, w2, b2, w3, b3, *, tile_b=1024,
                        use_bf16_matmul=True, out_dtype=jnp.float32):
    """phi: (B, 2) f32 -> (B, 512) `out_dtype` embedding.

    use_bf16_matmul=True: layers 2/3 run with bf16 MXU inputs (weights cast once here,
    activations cast in-kernel) and f32 accumulation; set False for strict f32 parity.
    out_dtype=jnp.bfloat16 halves output HBM writeback if the consumer accepts bf16.
    """
    B, K = phi.shape
    H = w1.shape[1]
    E = w3.shape[1]

    out_dtype = jnp.dtype(out_dtype)
    # Sublane granularity: 8 rows for 32-bit output, 16 for 16-bit (packed sublanes).
    gran = 8 if out_dtype.itemsize >= 4 else 16

    # Pad only to the sublane granularity; the batch tile is a divisor of the padded
    # size, so there is no per-tile over-compute and the final slice (only when
    # B % gran != 0) copies at most gran-1 extra rows.
    Bp = _round_up(B, gran)
    if Bp != B:
        phi = jnp.pad(phi, ((0, Bp - B), (0, 0)))
    tb = _choose_batch_tile(Bp, tile_b, gran)
    n_tiles = Bp // tb

    if use_bf16_matmul:
        w2 = w2.astype(jnp.bfloat16)
        w3 = w3.astype(jnp.bfloat16)

    w_bytes = 2 if use_bf16_matmul else 4
    flops = 2 * Bp * (K * H + H * H + H * E)
    transcendentals = 4 * Bp * H  # two SiLU layers; sigmoid ~ exp + reciprocal
    bytes_accessed = (4 * Bp * K + out_dtype.itemsize * Bp * E
                      + 4 * (K * H + H + H + E)
                      + w_bytes * (H * H + H * E))

    def build(const_pipeline_mode):
        kw = {} if const_pipeline_mode is None else {"pipeline_mode": const_pipeline_mode}
        in_specs = [
            pl.BlockSpec((tb, K), lambda i: (i, 0)),          # phi tile (pipelined)
            pl.BlockSpec(w1.shape, lambda i: (0, 0), **kw),   # (2, H)  VMEM-resident
            pl.BlockSpec(b1.shape, lambda i: (0, 0), **kw),   # (1, H)
            pl.BlockSpec(w2.shape, lambda i: (0, 0), **kw),   # (H, H)
            pl.BlockSpec(b2.shape, lambda i: (0, 0), **kw),   # (1, H)
            pl.BlockSpec(w3.shape, lambda i: (0, 0), **kw),   # (H, E)
            pl.BlockSpec(b3.shape, lambda i: (0, 0), **kw),   # (1, E)
        ]
        return pl.pallas_call(
            phi_mlp_kernel,
            out_shape=jax.ShapeDtypeStruct((Bp, E), out_dtype),
            grid=(n_tiles,),
            in_specs=in_specs,
            out_specs=pl.BlockSpec((tb, E), lambda i: (i, 0)),
            compiler_params=pltpu.CompilerParams(
                dimension_semantics=("parallel",),   # shard batch tiles across TCs (v7x)
            ),
            cost_estimate=pl.CostEstimate(
                flops=flops,
                transcendentals=transcendentals,
                bytes_accessed=bytes_accessed,
            ),
        )

    try:
        # Single-buffer the constant weight/bias blocks (they never change across the
        # grid) to save VMEM / DMA bookkeeping.
        out = build(pl.Buffered(1))(phi, w1, b1, w2, b2, w3, b3)
    except Exception:  # pragma: no cover - older JAX without single-buffer support
        out = build(None)(phi, w1, b1, w2, b2, w3, b3)

    return out if Bp == B else out[:B]


def init_linear_params(key, in_dim, out_dim):
    """PyTorch nn.Linear default init (U[-1/sqrt(fan_in), 1/sqrt(fan_in)]);
    weight returned as (in_dim, out_dim)."""
    kw, kb = jax.random.split(key)
    bound = 1.0 / math.sqrt(in_dim)
    w = jax.random.uniform(kw, (in_dim, out_dim), jnp.float32, -bound, bound)
    b = jax.random.uniform(kb, (1, out_dim), jnp.float32, -bound, bound)
    return w, b


def reference_mlp(phi, w1, b1, w2, b2, w3, b3):
    h1 = phi @ w1 + b1
    h1 = h1 * jax.nn.sigmoid(h1)
    h2 = h1 @ w2 + b2
    h2 = h2 * jax.nn.sigmoid(h2)
    return h2 @ w3 + b3


if __name__ == "__main__":
    input_phi_dim = 2
    hidden_dim = 128
    output_emb_dim = 512

    key = jax.random.PRNGKey(0)
    k_in, k1, k2, k3 = jax.random.split(key, 4)

    w1, b1 = init_linear_params(k1, input_phi_dim, hidden_dim)
    w2, b2 = init_linear_params(k2, hidden_dim, hidden_dim)
    w3, b3 = init_linear_params(k3, hidden_dim, output_emb_dim)

    # --- small module-typical batch, strict f32 path ---
    batch = 8
    phi = jax.random.uniform(k_in, (batch, input_phi_dim), jnp.float32, 0.0, 1.0)
    out = phi_embedding_cosmo(phi, w1, b1, w2, b2, w3, b3, use_bf16_matmul=False)
    out = jax.block_until_ready(out)
    ref = reference_mlp(phi, w1, b1, w2, b2, w3, b3)
    assert out.shape == (batch, output_emb_dim), out.shape
    assert jnp.allclose(out, ref, atol=1e-5, rtol=1e-5), "f32 path mismatch"

    # --- ragged batch: exercises 8-row padding + multi-tile grid, strict f32 ---
    batch2 = 37
    phi2 = jax.random.uniform(k_in, (batch2, input_phi_dim), jnp.float32, 0.0, 1.0)
    out2 = phi_embedding_cosmo(phi2, w1, b1, w2, b2, w3, b3, tile_b=16,
                               use_bf16_matmul=False)
    out2 = jax.block_until_ready(out2)
    ref2 = reference_mlp(phi2, w1, b1, w2, b2, w3, b3)
    assert out2.shape == (batch2, output_emb_dim), out2.shape
    assert jnp.allclose(out2, ref2, atol=1e-5, rtol=1e-5), "tiled f32 path mismatch"

    # --- default path (bf16 MXU inputs, f32 accumulation), loose tolerance ---
    out3 = phi_embedding_cosmo(phi2, w1, b1, w2, b2, w3, b3)
    out3 = jax.block_until_ready(out3)
    assert out3.shape == (batch2, output_emb_dim), out3.shape
    assert jnp.allclose(out3, ref2, atol=5e-2, rtol=5e-2), "bf16 path mismatch"

    print("KERNEL_OK")
</pallas_src>

<mosaic_0001>
module attributes {stable_mosaic.version = 11 : i64} {
  func.func @phi_mlp_kernel(%arg0: i32, %arg1: memref<8x2xf32, #tpu.memory_space<vmem>>, %arg2: memref<2x128xf32, #tpu.memory_space<vmem>>, %arg3: memref<1x128xf32, #tpu.memory_space<vmem>>, %arg4: memref<128x128xf32, #tpu.memory_space<vmem>>, %arg5: memref<1x128xf32, #tpu.memory_space<vmem>>, %arg6: memref<128x512xf32, #tpu.memory_space<vmem>>, %arg7: memref<1x512xf32, #tpu.memory_space<vmem>>, %arg8: memref<8x512xf32, #tpu.memory_space<vmem>>) attributes {dimension_semantics = [#tpu.dimension_semantics<parallel>], iteration_bounds = array<i64: 1>, scalar_prefetch = 0 : i64, scratch_operands = 0 : i64, tpu.core_type = #tpu.core_type<tc>, window_params = [{transform_indices = @transform_0, window_bounds = array<i64: 8, 2>}, {pipeline_mode = #tpu.pipeline_mode<synchronous>, transform_indices = @transform_1, window_bounds = array<i64: 2, 128>}, {pipeline_mode = #tpu.pipeline_mode<synchronous>, transform_indices = @transform_2, window_bounds = array<i64: 1, 128>}, {pipeline_mode = #tpu.pipeline_mode<synchronous>, transform_indices = @transform_3, window_bounds = array<i64: 128, 128>}, {pipeline_mode = #tpu.pipeline_mode<synchronous>, transform_indices = @transform_4, window_bounds = array<i64: 1, 128>}, {pipeline_mode = #tpu.pipeline_mode<synchronous>, transform_indices = @transform_5, window_bounds = array<i64: 128, 512>}, {pipeline_mode = #tpu.pipeline_mode<synchronous>, transform_indices = @transform_6, window_bounds = array<i64: 1, 512>}, {transform_indices = @transform_7, window_bounds = array<i64: 8, 512>}]} {
    %c0 = arith.constant 0 : index
    %c0_0 = arith.constant 0 : index
    %0 = vector.load %arg1[%c0, %c0_0] : memref<8x2xf32, #tpu.memory_space<vmem>>, vector<8x2xf32>
    %c0_1 = arith.constant 0 : index
    %c0_2 = arith.constant 0 : index
    %1 = vector.load %arg2[%c0_1, %c0_2] : memref<2x128xf32, #tpu.memory_space<vmem>>, vector<2x128xf32>
    %2 = vector.extract_strided_slice %0 {offsets = [0, 0], sizes = [8, 1], strides = [1, 1]} : vector<8x2xf32> to vector<8x1xf32>
    %3 = vector.extract_strided_slice %1 {offsets = [0, 0], sizes = [1, 128], strides = [1, 1]} : vector<2x128xf32> to vector<1x128xf32>
    %4 = vector.broadcast %2 : vector<8x1xf32> to vector<8x128xf32>
    %5 = vector.broadcast %3 : vector<1x128xf32> to vector<8x128xf32>
    %6 = arith.mulf %4, %5 : vector<8x128xf32>
    %7 = vector.extract_strided_slice %0 {offsets = [0, 1], sizes = [8, 1], strides = [1, 1]} : vector<8x2xf32> to vector<8x1xf32>
    %8 = vector.extract_strided_slice %1 {offsets = [1, 0], sizes = [1, 128], strides = [1, 1]} : vector<2x128xf32> to vector<1x128xf32>
    %9 = vector.broadcast %7 : vector<8x1xf32> to vector<8x128xf32>
    %10 = vector.broadcast %8 : vector<1x128xf32> to vector<8x128xf32>
    %11 = arith.mulf %9, %10 : vector<8x128xf32>
    %12 = arith.addf %6, %11 : vector<8x128xf32>
    %c0_3 = arith.constant 0 : index
    %c0_4 = arith.constant 0 : index
    %13 = vector.load %arg3[%c0_3, %c0_4] : memref<1x128xf32, #tpu.memory_space<vmem>>, vector<1x128xf32>
    %14 = vector.broadcast %13 : vector<1x128xf32> to vector<8x128xf32>
    %15 = arith.addf %12, %14 : vector<8x128xf32>
    %16 = arith.negf %15 : vector<8x128xf32>
    %17 = math.exp %16 : vector<8x128xf32>
    %cst = arith.constant 1.000000e+00 : f32
    %18 = vector.broadcast %cst : f32 to vector<8x128xf32>
    %19 = arith.addf %18, %17 : vector<8x128xf32>
    %20 = arith.divf %18, %19 : vector<8x128xf32>
    %21 = arith.mulf %15, %20 : vector<8x128xf32>
    %c0_5 = arith.constant 0 : index
    %c0_6 = arith.constant 0 : index
    %22 = vector.load %arg4[%c0_5, %c0_6] : memref<128x128xf32, #tpu.memory_space<vmem>>, vector<128x128xf32>
    %cst_7 = arith.constant dense<0.000000e+00> : vector<8x128xf32>
    %23 = tpu.matmul %21, %22, %cst_7 {dimension_numbers = #tpu.dot_dimension_numbers<[1], [0], [0], [1], [0, 0, 1, 1], [], []>} : vector<8x128xf32>, vector<128x128xf32>, vector<8x128xf32> -> vector<8x128xf32>
    %c0_8 = arith.constant 0 : index
    %c0_9 = arith.constant 0 : index
    %24 = vector.load %arg5[%c0_8, %c0_9] : memref<1x128xf32, #tpu.memory_space<vmem>>, vector<1x128xf32>
    %25 = vector.broadcast %24 : vector<1x128xf32> to vector<8x128xf32>
    %26 = arith.addf %23, %25 : vector<8x128xf32>
    %27 = arith.negf %26 : vector<8x128xf32>
    %28 = math.exp %27 : vector<8x128xf32>
    %cst_10 = arith.constant 1.000000e+00 : f32
    %29 = vector.broadcast %cst_10 : f32 to vector<8x128xf32>
    %30 = arith.addf %29, %28 : vector<8x128xf32>
    %31 = arith.divf %29, %30 : vector<8x128xf32>
    %32 = arith.mulf %26, %31 : vector<8x128xf32>
    %c0_11 = arith.constant 0 : index
    %c0_12 = arith.constant 0 : index
    %33 = vector.load %arg6[%c0_11, %c0_12] : memref<128x512xf32, #tpu.memory_space<vmem>>, vector<128x512xf32>
    %cst_13 = arith.constant dense<0.000000e+00> : vector<8x512xf32>
    %34 = tpu.matmul %32, %33, %cst_13 {dimension_numbers = #tpu.dot_dimension_numbers<[1], [0], [0], [1], [0, 0, 1, 1], [], []>} : vector<8x128xf32>, vector<128x512xf32>, vector<8x512xf32> -> vector<8x512xf32>
    %c0_14 = arith.constant 0 : index
    %c0_15 = arith.constant 0 : index
    %35 = vector.load %arg7[%c0_14, %c0_15] : memref<1x512xf32, #tpu.memory_space<vmem>>, vector<1x512xf32>
    %36 = vector.broadcast %35 : vector<1x512xf32> to vector<8x512xf32>
    %37 = arith.addf %34, %36 : vector<8x512xf32>
    %c0_16 = arith.constant 0 : index
    %c0_17 = arith.constant 0 : index
    %38 = vector.load %arg8[%c0_16, %c0_17] : memref<8x512xf32, #tpu.memory_space<vmem>>, vector<8x512xf32>
    tpu.vector_store %arg8[%c0_16, %c0_17], %37 {strides = array<i32>} : memref<8x512xf32, #tpu.memory_space<vmem>>, vector<8x512xf32>,
    return
  }
  func.func @transform_0(%arg0: i32) -> (i32, i32) {
    %c0_i32 = arith.constant 0 : i32
    %c0_i32_0 = arith.constant 0 : i32
    return %arg0, %c0_i32 : i32, i32
  }
  func.func @transform_1(%arg0: i32) -> (i32, i32) {
    %c0_i32 = arith.constant 0 : i32
    %c0_i32_0 = arith.constant 0 : i32
    %c0_i32_1 = arith.constant 0 : i32
    return %c0_i32, %c0_i32_0 : i32, i32
  }
  func.func @transform_2(%arg0: i32) -> (i32, i32) {
    %c0_i32 = arith.constant 0 : i32
    %c0_i32_0 = arith.constant 0 : i32
    %c0_i32_1 = arith.constant 0 : i32
    return %c0_i32, %c0_i32_0 : i32, i32
  }
  func.func @transform_3(%arg0: i32) -> (i32, i32) {
    %c0_i32 = arith.constant 0 : i32
    %c0_i32_0 = arith.constant 0 : i32
    %c0_i32_1 = arith.constant 0 : i32
    return %c0_i32, %c0_i32_0 : i32, i32
  }
  func.func @transform_4(%arg0: i32) -> (i32, i32) {
    %c0_i32 = arith.constant 0 : i32
    %c0_i32_0 = arith.constant 0 : i32
    %c0_i32_1 = arith.constant 0 : i32
    return %c0_i32, %c0_i32_0 : i32, i32
  }
  func.func @transform_5(%arg0: i32) -> (i32, i32) {
    %c0_i32 = arith.constant 0 : i32
    %c0_i32_0 = arith.constant 0 : i32
    %c0_i32_1 = arith.constant 0 : i32
    return %c0_i32, %c0_i32_0 : i32, i32
  }
  func.func @transform_6(%arg0: i32) -> (i32, i32) {
    %c0_i32 = arith.constant 0 : i32
    %c0_i32_0 = arith.constant 0 : i32
    %c0_i32_1 = arith.constant 0 : i32
    return %c0_i32, %c0_i32_0 : i32, i32
  }
  func.func @transform_7(%arg0: i32) -> (i32, i32) {
    %c0_i32 = arith.constant 0 : i32
    %c0_i32_0 = arith.constant 0 : i32
    return %arg0, %c0_i32 : i32, i32
  }
}

module attributes {stable_mosaic.version = 11 : i64} {
  func.func @phi_mlp_kernel(%arg0: i32, %arg1: memref<8x2xf32, #tpu.memory_space<vmem>>, %arg2: memref<2x128xf32, #tpu.memory_space<vmem>>, %arg3: memref<1x128xf32, #tpu.memory_space<vmem>>, %arg4: memref<128x128xf32, #tpu.memory_space<vmem>>, %arg5: memref<1x128xf32, #tpu.memory_space<vmem>>, %arg6: memref<128x512xf32, #tpu.memory_space<vmem>>, %arg7: memref<1x512xf32, #tpu.memory_space<vmem>>, %arg8: memref<8x512xf32, #tpu.memory_space<vmem>>) attributes {dimension_semantics = [#tpu.dimension_semantics<parallel>], iteration_bounds = array<i64: 1>, scalar_prefetch = 0 : i64, scratch_operands = 0 : i64, tpu.core_type = #tpu.core_type<tc>, window_params = [{transform_indices = @transform_0, window_bounds = array<i64: 8, 2>}, {pipeline_mode = #tpu.pipeline_mode<synchronous>, transform_indices = @transform_1, window_bounds = array<i64: 2, 128>}, {pipeline_mode = #tpu.pipeline_mode<synchronous>, transform_indices = @transform_2, window_bounds = array<i64: 1, 128>}, {pipeline_mode = #tpu.pipeline_mode<synchronous>, transform_indices = @transform_3, window_bounds = array<i64: 128, 128>}, {pipeline_mode = #tpu.pipeline_mode<synchronous>, transform_indices = @transform_4, window_bounds = array<i64: 1, 128>}, {pipeline_mode = #tpu.pipeline_mode<synchronous>, transform_indices = @transform_5, window_bounds = array<i64: 128, 512>}, {pipeline_mode = #tpu.pipeline_mode<synchronous>, transform_indices = @transform_6, window_bounds = array<i64: 1, 512>}, {transform_indices = @transform_7, window_bounds = array<i64: 8, 512>}]} {
    %c0 = arith.constant 0 : index
    %c0_0 = arith.constant 0 : index
    %0 = vector.load %arg1[%c0, %c0_0] : memref<8x2xf32, #tpu.memory_space<vmem>>, vector<8x2xf32>
    %c0_1 = arith.constant 0 : index
    %c0_2 = arith.constant 0 : index
    %1 = vector.load %arg2[%c0_1, %c0_2] : memref<2x128xf32, #tpu.memory_space<vmem>>, vector<2x128xf32>
    %2 = vector.extract_strided_slice %0 {offsets = [0, 0], sizes = [8, 1], strides = [1, 1]} : vector<8x2xf32> to vector<8x1xf32>
    %3 = vector.extract_strided_slice %1 {offsets = [0, 0], sizes = [1, 128], strides = [1, 1]} : vector<2x128xf32> to vector<1x128xf32>
    %4 = vector.broadcast %2 : vector<8x1xf32> to vector<8x128xf32>
    %5 = vector.broadcast %3 : vector<1x128xf32> to vector<8x128xf32>
    %6 = arith.mulf %4, %5 : vector<8x128xf32>
    %7 = vector.extract_strided_slice %0 {offsets = [0, 1], sizes = [8, 1], strides = [1, 1]} : vector<8x2xf32> to vector<8x1xf32>
    %8 = vector.extract_strided_slice %1 {offsets = [1, 0], sizes = [1, 128], strides = [1, 1]} : vector<2x128xf32> to vector<1x128xf32>
    %9 = vector.broadcast %7 : vector<8x1xf32> to vector<8x128xf32>
    %10 = vector.broadcast %8 : vector<1x128xf32> to vector<8x128xf32>
    %11 = arith.mulf %9, %10 : vector<8x128xf32>
    %12 = arith.addf %6, %11 : vector<8x128xf32>
    %c0_3 = arith.constant 0 : index
    %c0_4 = arith.constant 0 : index
    %13 = vector.load %arg3[%c0_3, %c0_4] : memref<1x128xf32, #tpu.memory_space<vmem>>, vector<1x128xf32>
    %14 = vector.broadcast %13 : vector<1x128xf32> to vector<8x128xf32>
    %15 = arith.addf %12, %14 : vector<8x128xf32>
    %16 = arith.negf %15 : vector<8x128xf32>
    %17 = math.exp %16 : vector<8x128xf32>
    %cst = arith.constant 1.000000e+00 : f32
    %18 = vector.broadcast %cst : f32 to vector<8x128xf32>
    %19 = arith.addf %18, %17 : vector<8x128xf32>
    %20 = arith.divf %18, %19 : vector<8x128xf32>
    %21 = arith.mulf %15, %20 : vector<8x128xf32>
    %c0_5 = arith.constant 0 : index
    %c0_6 = arith.constant 0 : index
    %22 = vector.load %arg4[%c0_5, %c0_6] : memref<128x128xf32, #tpu.memory_space<vmem>>, vector<128x128xf32>
    %cst_7 = arith.constant dense<0.000000e+00> : vector<8x128xf32>
    %23 = tpu.matmul %21, %22, %cst_7 {dimension_numbers = #tpu.dot_dimension_numbers<[1], [0], [0], [1], [0, 0, 1, 1], [], []>} : vector<8x128xf32>, vector<128x128xf32>, vector<8x128xf32> -> vector<8x128xf32>
    %c0_8 = arith.constant 0 : index
    %c0_9 = arith.constant 0 : index
    %24 = vector.load %arg5[%c0_8, %c0_9] : memref<1x128xf32, #tpu.memory_space<vmem>>, vector<1x128xf32>
    %25 = vector.broadcast %24 : vector<1x128xf32> to vector<8x128xf32>
    %26 = arith.addf %23, %25 : vector<8x128xf32>
    %27 = arith.negf %26 : vector<8x128xf32>
    %28 = math.exp %27 : vector<8x128xf32>
    %cst_10 = arith.constant 1.000000e+00 : f32
    %29 = vector.broadcast %cst_10 : f32 to vector<8x128xf32>
    %30 = arith.addf %29, %28 : vector<8x128xf32>
    %31 = arith.divf %29, %30 : vector<8x128xf32>
    %32 = arith.mulf %26, %31 : vector<8x128xf32>
    %c0_11 = arith.constant 0 : index
    %c0_12 = arith.constant 0 : index
    %33 = vector.load %arg6[%c0_11, %c0_12] : memref<128x512xf32, #tpu.memory_space<vmem>>, vector<128x512xf32>
    %cst_13 = arith.constant dense<0.000000e+00> : vector<8x512xf32>
    %34 = tpu.matmul %32, %33, %cst_13 {dimension_numbers = #tpu.dot_dimension_numbers<[1], [0], [0], [1], [0, 0, 1, 1], [], []>} : vector<8x128xf32>, vector<128x512xf32>, vector<8x512xf32> -> vector<8x512xf32>
    %c0_14 = arith.constant 0 : index
    %c0_15 = arith.constant 0 : index
    %35 = vector.load %arg7[%c0_14, %c0_15] : memref<1x512xf32, #tpu.memory_space<vmem>>, vector<1x512xf32>
    %36 = vector.broadcast %35 : vector<1x512xf32> to vector<8x512xf32>
    %37 = arith.addf %34, %36 : vector<8x512xf32>
    %c0_16 = arith.constant 0 : index
    %c0_17 = arith.constant 0 : index
    %38 = vector.load %arg8[%c0_16, %c0_17] : memref<8x512xf32, #tpu.memory_space<vmem>>, vector<8x512xf32>
    tpu.vector_store %arg8[%c0_16, %c0_17], %37 {strides = array<i32>} : memref<8x512xf32, #tpu.memory_space<vmem>>, vector<8x512xf32>,
    return
  }
  func.func @transform_0(%arg0: i32) -> (i32, i32) {
    %c0_i32 = arith.constant 0 : i32
    %c0_i32_0 = arith.constant 0 : i32
    return %arg0, %c0_i32 : i32, i32
  }
  func.func @transform_1(%arg0: i32) -> (i32, i32) {
    %c0_i32 = arith.constant 0 : i32
    %c0_i32_0 = arith.constant 0 : i32
    %c0_i32_1 = arith.constant 0 : i32
    return %c0_i32, %c0_i32_0 : i32, i32
  }
  func.func @transform_2(%arg0: i32) -> (i32, i32) {
    %c0_i32 = arith.constant 0 : i32
    %c0_i32_0 = arith.constant 0 : i32
    %c0_i32_1 = arith.constant 0 : i32
    return %c0_i32, %c0_i32_0 : i32, i32
  }
  func.func @transform_3(%arg0: i32) -> (i32, i32) {
    %c0_i32 = arith.constant 0 : i32
    %c0_i32_0 = arith.constant 0 : i32
    %c0_i32_1 = arith.constant 0 : i32
    return %c0_i32, %c0_i32_0 : i32, i32
  }
  func.func @transform_4(%arg0: i32) -> (i32, i32) {
    %c0_i32 = arith.constant 0 : i32
    %c0_i32_0 = arith.constant 0 : i32
    %c0_i32_1 = arith.constant 0 : i32
    return %c0_i32, %c0_i32_0 : i32, i32
  }
  func.func @transform_5(%arg0: i32) -> (i32, i32) {
    %c0_i32 = arith.constant 0 : i32
    %c0_i32_0 = arith.constant 0 : i32
    %c0_i32_1 = arith.constant 0 : i32
    return %c0_i32, %c0_i32_0 : i32, i32
  }
  func.func @transform_6(%arg0: i32) -> (i32, i32) {
    %c0_i32 = arith.constant 0 : i32
    %c0_i32_0 = arith.constant 0 : i32
    %c0_i32_1 = arith.constant 0 : i32
    return %c0_i32, %c0_i32_0 : i32, i32
  }
  func.func @transform_7(%arg0: i32) -> (i32, i32) {
    %c0_i32 = arith.constant 0 : i32
    %c0_i32_0 = arith.constant 0 : i32
    return %arg0, %c0_i32 : i32, i32
  }
}

</mosaic_0001>

<bundles_post_ra>
// kernel: tpu_custom_call.1
= control target key start
LH: loop header
LB: loop body
LE: loop exit
PB: predicated region body
PF: predicated region fallthrough
CT: control target
= control target key end

     0   :  { %12 = vsyncpa [#allocation3], 0  ;;  %s510_s0 = inlined_call_operand.vmem [shape: f32[8,2], index: 0, kind: input, shape index: {}]   ;;  %s511_s1 = inlined_call_operand.vmem [shape: f32[2,128], index: 1, kind: input, shape index: {}]   ;;  %s512_s2 = inlined_call_operand.vmem [shape: f32[1,128], index: 2, kind: input, shape index: {}]   ;;  %s513_s3 = inlined_call_operand.hbm [shape: f32[128,128], index: 3, kind: input, shape index: {}]   ;;  %s514_s4 = inlined_call_operand.vmem [shape: f32[1,128], index: 4, kind: input, shape index: {}]   ;;  %s515_s5 = inlined_call_operand.hbm [shape: f32[128,512], index: 5, kind: input, shape index: {}]   ;;  %s516_s6 = inlined_call_operand.vmem [shape: f32[1,512], index: 6, kind: input, shape index: {}]   ;;  %s517_s7 = inlined_call_operand.hbm [shape: f32[8,512], index: 7, kind: output, shape index: {}]  }
   0x1   :  { %13 = vsyncpa [#allocation6], 0 }
   0x2   :  { %14 = vsyncpa [#allocation4], 0  ;;  %s25_s26 = sshll.u32 %s513_s3, 4  ;;  %s437_s27 = smov [#allocation2]   ;;  %s26_s26 = int_to_ptr.hbm [resolvable:$true] %s25_s26 }
   0x3   :  { %s27_s28 = sshll.u32 %s437_s27, 4  ;;  %s40_s8 = sshll.u32 %s515_s5, 4  ;;  %s28_s28 = int_to_ptr.vmem [resolvable:$true] %s27_s28  ;;  %s41_s8 = int_to_ptr.hbm [resolvable:$true] %s40_s8 }
   0x4   :  { %s438_s9 = smov 128   ;;  %s439_s10 = smov 8  }
   0x5   :  { %33 = dma.hbm_to_vmem [thread:$0]  %s26_s26, 2048, %s28_s28, [#allocation3], %s438_s9, %s438_s9, %s439_s10  }
   0x6   :  { %s440_s11 = smov [#allocation5]   ;;  %s441_s13 = smov 512  }
   0x7   :  { %s42_s12 = sshll.u32 %s440_s11, 4  ;;  %s442_s14 = smov 32   ;;  %s43_s12 = int_to_ptr.vmem [resolvable:$true] %s42_s12 }
   0x8   :  { %48 = dma.hbm_to_vmem [thread:$0]  %s41_s8, 8192, %s43_s12, [#allocation6], %s441_s13, %s441_s13, %s442_s14  }
   0x9   :  { %431 = dma.done.wait [#allocation3], 2048  }
   0xa   :  { %432 = vsyncadd [#allocation3], 4294965248 }
   0xb   :  { %433 = dma.done.wait [#allocation6], 8192  }
   0xc   :  { %434 = vsyncadd [#allocation6], 4294959104  ;;  %v443_v0 = vmov 0   ;;  %v59_v1 = vld [vmem:[%s510_s0] sm:$0xff]  ;;  %v444_v2 = vmov 1   ;;  %v115_v3 = vld [vmem:[#allocation2 + $0x78] sm:$0xff] }
   0xd   :  { %347 = vset.pattern.permute.xlu0 %v443_v0  ;;  %v114_v4 = vld [vmem:[#allocation2 + $0x70] sm:$0xff]  ;;  %120 = vmatpush.msra.mxu0 %v115_v3  ;;  %v113_v5 = vld [vmem:[#allocation2 + $0x68] sm:$0xff]  ;;  %v112_v6 = vld [vmem:[#allocation2 + $0x60] sm:$0xff]  ;;  %s445_s19 = smov [#allocation7]   ;;  %s325_s23 = sshll.u32 %s517_s7, 4  ;;  %s326_s23 = int_to_ptr.hbm [resolvable:$true] %s325_s23 }
   0xe   :  { %63 = vperm.xlu0 %347, %v59_v1   ;;  %v111_v7 = vld [vmem:[#allocation2 + $0x58] sm:$0xff]  ;;  %v110_v8 = vld [vmem:[#allocation2 + $0x50] sm:$0xff]  ;;  %v109_v9 = vld [vmem:[#allocation2 + $0x48] sm:$0xff]  ;;  %s323_s20 = sshll.u32 %s445_s19, 4  ;;  %s324_s20 = int_to_ptr.vmem [resolvable:$true] %s323_s20 }
   0xf   :  { %121 = vmatpush.msra.mxu0 %v114_v4  ;;  %v108_v10 = vld [vmem:[#allocation2 + $0x40] sm:$0xff]  ;;  %v107_v11 = vld [vmem:[#allocation2 + $0x38] sm:$0xff]  ;;  %v106_v12 = vld [vmem:[#allocation2 + $0x30] sm:$0xff] }
  0x10   :  { %v105_v13 = vld [vmem:[#allocation2 + $0x28] sm:$0xff]  ;;  %v104_v15 = vld [vmem:[#allocation2 + $0x20] sm:$0xff]  ;;  %v103_v16 = vld [vmem:[#allocation2 + $0x18] sm:$0xff] }
  0x11   :  { %122 = vmatpush.msra.mxu0 %v113_v5  ;;  %v60_v17 = vld [vmem:[%s511_s1] sm:$0x3]  ;;  %v102_v18 = vld [vmem:[#allocation2 + $0x10] sm:$0xff]  ;;  %v101_v21 = vld [vmem:[#allocation2 + $0x8] sm:$0xff] }
  0x12   :  { %v66_v19 = vperm.slane %v60_v17, 0  ;;  %v72_v20 = vperm.slane %v60_v17, 1  ;;  %v100_v22 = vld [vmem:[#allocation2] sm:$0xff]  ;;  %v221_v44 = vld [vmem:[#allocation5 + $0x1e8] sm:$0xff]  ;;  %v222_v45 = vld [vmem:[#allocation5 + $0x1f0] sm:$0xff] }
  0x13   :  { %123 = vmatpush.msra.mxu0 %v112_v6  ;;  %v349_v26 = vld [vmem:[%s512_s2] ss:$0 sm:$0xff]  ;;  %254 = vmatpush.msra.mxu2 %v221_v44  ;;  %v223_v46 = vld [vmem:[#allocation5 + $0x1f8] sm:$0xff]  ;;  %v217_v48 = vld [vmem:[#allocation5 + $0x1c8] sm:$0xff] }
  0x14   :  { %v220_v43 = vld [vmem:[#allocation5 + $0x1e0] sm:$0xff]  ;;  %274 = vmatpush.msra.mxu3 %v222_v45  ;;  %v218_v49 = vld [vmem:[#allocation5 + $0x1d0] sm:$0xff]  ;;  %v219_v50 = vld [vmem:[#allocation5 + $0x1d8] sm:$0xff] }
  0x15   :  { %124 = vmatpush.msra.mxu0 %v111_v7  ;;  %234 = vmatpush.msra.mxu1 %v220_v43  ;;  %v216_v47 = vld [vmem:[#allocation5 + $0x1c0] sm:$0xff]  ;;  %v213_v52 = vld [vmem:[#allocation5 + $0x1a8] sm:$0xff]  ;;  %v214_v53 = vld [vmem:[#allocation5 + $0x1b0] sm:$0xff] }
  0x16   :  { %348 = vset.pattern.permute.xlu0 %v444_v2  ;;  %255 = vmatpush.msra.mxu2 %v217_v48  ;;  %v212_v51 = vld [vmem:[#allocation5 + $0x1a0] sm:$0xff]  ;;  %v215_v54 = vld [vmem:[#allocation5 + $0x1b8] sm:$0xff]  ;;  %v209_v56 = vld [vmem:[#allocation5 + $0x188] sm:$0xff] }
  0x17   :  { %69 = vperm.xlu0 %348, %v59_v1   ;;  %125 = vmatpush.msra.mxu0 %v110_v8  ;;  %v208_v55 = vld [vmem:[#allocation5 + $0x180] sm:$0xff]  ;;  %v210_v57 = vld [vmem:[#allocation5 + $0x190] sm:$0xff]  ;;  %v211_v58 = vld [vmem:[#allocation5 + $0x198] sm:$0xff] }
  0x18   :  { %235 = vmatpush.msra.mxu1 %v216_v47  ;;  %275 = vmatpush.msra.mxu3 %v218_v49  ;;  %v204_v59 = vld [vmem:[#allocation5 + $0x160] sm:$0xff]  ;;  %v205_v60 = vld [vmem:[#allocation5 + $0x168] sm:$0xff]  ;;  %v206_v61 = vld [vmem:[#allocation5 + $0x170] sm:$0xff] }
  0x19   :  { %126 = vmatpush.msra.mxu0 %v109_v9  ;;  %256 = vmatpush.msra.mxu2 %v213_v52  ;;  %v207_v62 = vld [vmem:[#allocation5 + $0x178] sm:$0xff]  ;;  %v200_v63 = vld [vmem:[#allocation5 + $0x140] sm:$0xff]  ;;  %v201_v0 = vld [vmem:[#allocation5 + $0x148] sm:$0xff] }
  0x1a   :  { %236 = vmatpush.msra.mxu1 %v212_v51  ;;  %276 = vmatpush.msra.mxu3 %v214_v53  ;;  %v202_v1 = vld [vmem:[#allocation5 + $0x150] sm:$0xff]  ;;  %v203_v2 = vld [vmem:[#allocation5 + $0x158] sm:$0xff]  ;;  %v196_v3 = vld [vmem:[#allocation5 + $0x120] sm:$0xff] }
  0x1b   :  { %127 = vmatpush.msra.mxu0 %v108_v10  ;;  %257 = vmatpush.msra.mxu2 %v209_v56  ;;  %v197_v4 = vld [vmem:[#allocation5 + $0x128] sm:$0xff]  ;;  %v198_v5 = vld [vmem:[#allocation5 + $0x130] sm:$0xff]  ;;  %v199_v6 = vld [vmem:[#allocation5 + $0x138] sm:$0xff] }
  0x1c   :  { %237 = vmatpush.msra.mxu1 %v208_v55  ;;  %277 = vmatpush.msra.mxu3 %v210_v57  ;;  %v192_v7 = vld [vmem:[#allocation5 + $0x100] sm:$0xff]  ;;  %v193_v8 = vld [vmem:[#allocation5 + $0x108] sm:$0xff]  ;;  %v194_v9 = vld [vmem:[#allocation5 + $0x110] sm:$0xff] }
  0x1d   :  { %128 = vmatpush.msra.mxu0 %v107_v11  ;;  %258 = vmatpush.msra.mxu2 %v205_v60  ;;  %v195_v10 = vld [vmem:[#allocation5 + $0x118] sm:$0xff]  ;;  %v188_v11 = vld [vmem:[#allocation5 + $0xe0] sm:$0xff]  ;;  %v186_v17 = vld [vmem:[#allocation5 + $0xd0] sm:$0xff] }
  0x1e   :  { %238 = vmatpush.msra.mxu1 %v204_v59  ;;  %278 = vmatpush.msra.mxu3 %v206_v61  ;;  %v163_v44 = vld [vmem:[#allocation5 + $0x18] sm:$0xff]  ;;  %v224_v60 = vld [vmem:[%s516_s6] sm:$0xf] }
  0x1f   :  { %129 = vmatpush.msra.mxu0 %v106_v12  ;;  %259 = vmatpush.msra.mxu2 %v201_v0  ;;  %v189_v12 = vld [vmem:[#allocation5 + $0xe8] sm:$0xff]  ;;  %v226_v61 = vperm.slane %v224_v60, 0 }
  0x20   :  { %239 = vmatpush.msra.mxu1 %v200_v63  ;;  %279 = vmatpush.msra.mxu3 %v202_v1 }
  0x21   :  { %130 = vmatpush.msra.mxu0 %v105_v13  ;;  %260 = vmatpush.msra.mxu2 %v197_v4  ;;  %v190_v13 = vld [vmem:[#allocation5 + $0xf0] sm:$0xff]  ;;  %v228_v4 = vperm.slane %v224_v60, 2 }
  0x22   :  { %240 = vmatpush.msra.mxu1 %v196_v3  ;;  %280 = vmatpush.msra.mxu3 %v198_v5  ;;  %v227_v3 = vperm.slane %v224_v60, 1 }
  0x23   :  { %131 = vmatpush.msra.mxu0 %v104_v15  ;;  %261 = vmatpush.msra.mxu2 %v193_v8  ;;  %v184_v15 = vld [vmem:[#allocation5 + $0xc0] sm:$0xff] }
  0x24   :  { %241 = vmatpush.msra.mxu1 %v192_v7  ;;  %281 = vmatpush.msra.mxu3 %v194_v9 }
  0x25   :  { %132 = vmatpush.msra.mxu0 %v103_v16  ;;  %262 = vmatpush.msra.mxu2 %v189_v12  ;;  %v185_v16 = vld [vmem:[#allocation5 + $0xc8] sm:$0xff] }
  0x26   :  { %242 = vmatpush.msra.mxu1 %v188_v11  ;;  %282 = vmatpush.msra.mxu3 %v190_v13 }
  0x27   :  { %133 = vmatpush.msra.mxu0 %v102_v18  ;;  %263 = vmatpush.msra.mxu2 %v185_v16  ;;  %v187_v18 = vld [vmem:[#allocation5 + $0xd8] sm:$0xff] }
  0x28   :  { %243 = vmatpush.msra.mxu1 %v184_v15  ;;  %283 = vmatpush.msra.mxu3 %v186_v17 }
  0x29   :  { %134 = vmatpush.msra.mxu0 %v101_v21  ;;  %v182_v21 = vld [vmem:[#allocation5 + $0xb0] sm:$0xff] }
  0x2a   :  { %284 = vmatpush.msra.mxu3 %v182_v21 }
  0x2b   :  { %135 = vmatpush.msra.mxu0 %v100_v22  ;;  %v183_v22 = vld [vmem:[#allocation5 + $0xb8] sm:$0xff] }
  0x2d   :  { %294 = vmatpush.msrb.mxu0 %v223_v46 }
  0x2f   :  { %295 = vmatpush.msrb.mxu0 %v219_v50 }
  0x31   :  { %296 = vmatpush.msrb.mxu0 %v215_v54 }
  0x33   :  { %297 = vmatpush.msrb.mxu0 %v211_v58 }
  0x35   :  { %298 = vmatpush.msrb.mxu0 %v207_v62  ;;  %v229_v62 = vperm.slane %v224_v60, 3 }
  0x37   :  { %299 = vmatpush.msrb.mxu0 %v203_v2 }
  0x39   :  { %300 = vmatpush.msrb.mxu0 %v199_v6 }
  0x3b   :  { %301 = vmatpush.msrb.mxu0 %v195_v10 }
  0x80   :  { %v64_v14 = vpop.permute.xlu0 %63 }
  0x81   :  { %v67_v24 = vmul.f32 %v66_v19, %v64_v14  ;;  %v191_v14 = vld [vmem:[#allocation5 + $0xf8] sm:$0xff]  ;;  %v180_v19 = vld [vmem:[#allocation5 + $0xa0] sm:$0xff] }
  0x82   :  { %302 = vmatpush.msrb.mxu0 %v191_v14  ;;  %244 = vmatpush.msra.mxu1 %v180_v19 }
  0x84   :  { %303 = vmatpush.msrb.mxu0 %v187_v18 }
  0x86   :  { %304 = vmatpush.msrb.mxu0 %v183_v22 }
  0x89   :  { %v70_v23 = vpop.permute.xlu0 %69 }
  0x8a   :  { %v73_v25 = vmul.f32 %v72_v20, %v70_v23  ;;  %v181_v20 = vld [vmem:[#allocation5 + $0xa8] sm:$0xff]  ;;  %v176_v23 = vld [vmem:[#allocation5 + $0x80] sm:$0xff] }
  0x8b   :  { %264 = vmatpush.msra.mxu2 %v181_v20  ;;  %245 = vmatpush.msra.mxu1 %v176_v23 }
  0x8c   :  { %v74_v27 = vadd.f32 %v73_v25, %v67_v24  ;;  %v177_v24 = vld [vmem:[#allocation5 + $0x88] sm:$0xff]  ;;  %v178_v25 = vld [vmem:[#allocation5 + $0x90] sm:$0xff] }
  0x8d   :  { %265 = vmatpush.msra.mxu2 %v177_v24  ;;  %285 = vmatpush.msra.mxu3 %v178_v25 }
  0x8e   :  { %v79_v28 = vadd.f32 %v349_v26, %v74_v27  ;;  %v179_v26 = vld [vmem:[#allocation5 + $0x98] sm:$0xff]  ;;  %v172_v27 = vld [vmem:[#allocation5 + $0x60] sm:$0xff] }
  0x8f   :  { %305 = vmatpush.msrb.mxu0 %v179_v26  ;;  %246 = vmatpush.msra.mxu1 %v172_v27 }
  0x90   :  { %v336_v29 = vmul.f32 -1.442695, %v79_v28 }
  0x92   :  { %351 = vpow2.f32 %v336_v29  ;;  %v174_v29 = vld [vmem:[#allocation5 + $0x70] sm:$0xff] }
  0x93   :  { %286 = vmatpush.msra.mxu3 %v174_v29 }
  0x98   :  { %v352_v30 = vpop.eup %351 }
  0x99   :  { %v83_v31 = vadd.f32 1.0, %v352_v30  ;;  %v175_v30 = vld [vmem:[#allocation5 + $0x78] sm:$0xff] }
  0x9a   :  { %306 = vmatpush.msrb.mxu0 %v175_v30 }
  0x9b   :  { %353 = vrcp.f32 %v83_v31  ;;  %v95_v35 = vand.u32 2147483648, %v83_v31  ;;  %v93_v37 = vand.u32 2147483647, %v83_v31  ;;  %vm89_vm1 = vweird.f32 %v83_v31 }
  0x9d   :  { %v96_v39 = vor.u32 1.1754944e-38, %v95_v35  ;;  %vm94_vm3 = vcmp.eq.f32.partialorder %v93_v37, 8.507059e+37  ;;  %v171_v35 = vld [vmem:[#allocation5 + $0x58] sm:$0xff]  ;;  %v165_v37 = vld [vmem:[#allocation5 + $0x28] sm:$0xff] }
  0x9e   :  { %307 = vmatpush.msrb.mxu0 %v171_v35 }
  0xa1   :  { %v354_v32 = vpop.eup %353 }
  0xa2   :  { %v85_v33 = vmul.f32 %v354_v32, %v83_v31  ;;  %vm90_vm0 = vweird.f32 %v354_v32  ;;  %v168_v31 = vld [vmem:[#allocation5 + $0x40] sm:$0xff] }
  0xa3   :  { %vm91_vm2 = vmor %vm89_vm1, %vm90_vm0  ;;  %247 = vmatpush.msra.mxu1 %v168_v31 }
  0xa4   :  { %v86_v34 = vsub.f32 1.0, %v85_v33  ;;  %v170_v33 = vld [vmem:[#allocation5 + $0x50] sm:$0xff] }
  0xa5   :  { %287 = vmatpush.msra.mxu3 %v170_v33 }
  0xa6   :  { %v87_v36 = vmul.f32 %v354_v32, %v86_v34  ;;  %v350_v34 = vld [vmem:[%s514_s4] ss:$0 sm:$0xff] }
  0xa8   :  { %v88_v38 = vadd.f32 %v354_v32, %v87_v36  ;;  %v164_v36 = vld [vmem:[#allocation5 + $0x20] sm:$0xff] }
  0xa9   :  { %248 = vmatpush.msra.mxu1 %v164_v36 }
  0xaa   :  { %v92_v40 = vsel %vm91_vm2, %v354_v32, %v88_v38  ;;  %v169_v32 = vld [vmem:[#allocation5 + $0x48] sm:$0xff]  ;;  %v166_v38 = vld [vmem:[#allocation5 + $0x30] sm:$0xff] }
  0xab   :  { %v97_v41 = vsel %vm94_vm3, %v96_v39, %v92_v40  ;;  %v167_v39 = vld [vmem:[#allocation5 + $0x38] sm:$0xff]  ;;  %288 = vmatpush.msra.mxu3 %v166_v38  ;;  %v160_v40 = vld [vmem:[#allocation5] sm:$0xff] }
  0xac   :  { %v99_v42 = vmul.f32 %v97_v41, %v79_v28  ;;  %v173_v28 = vld [vmem:[#allocation5 + $0x68] sm:$0xff]  ;;  %308 = vmatpush.msrb.mxu0 %v167_v39  ;;  %249 = vmatpush.msra.mxu1 %v160_v40 }
  0xad   :  { %266 = vmatpush.msra.mxu2 %v173_v28  ;;  %v161_v41 = vld [vmem:[#allocation5 + $0x8] sm:$0xff] }
  0xae   :  { %136 = vmatmul.f32.vlgmr.msra.gmra.mxu0 %v99_v42  ;;  %v162_v42 = vld [vmem:[#allocation5 + $0x10] sm:$0xff] }
  0xaf   :  { %267 = vmatpush.msra.mxu2 %v169_v32  ;;  %289 = vmatpush.msra.mxu3 %v162_v42 }
  0xb0   :  { %309 = vmatpush.msrb.mxu0 %v163_v44 }
  0xb1   :  { %268 = vmatpush.msra.mxu2 %v165_v37 }
  0xb3   :  { %269 = vmatpush.msra.mxu2 %v161_v41 }
 0x12b   :  { %v137_v43 = vpop.f32.mrf.mxu0 }
 0x12c   :  { %v138_v45 = vadd.f32 %v350_v34, %v137_v43 }
 0x12e   :  { %v337_v46 = vmul.f32 -1.442695, %v138_v45 }
 0x130   :  { %355 = vpow2.f32 %v337_v46 }
 0x136   :  { %v356_v47 = vpop.eup %355 }
 0x137   :  { %v143_v48 = vadd.f32 1.0, %v356_v47 }
 0x139   :  { %357 = vrcp.f32 %v143_v48  ;;  %v155_v52 = vand.u32 2147483648, %v143_v48  ;;  %v153_v54 = vand.u32 2147483647, %v143_v48  ;;  %vm149_vm5 = vweird.f32 %v143_v48 }
 0x13b   :  { %v156_v56 = vor.u32 1.1754944e-38, %v155_v52  ;;  %vm154_vm7 = vcmp.eq.f32.partialorder %v153_v54, 8.507059e+37 }
 0x13f   :  { %v358_v49 = vpop.eup %357 }
 0x140   :  { %v145_v50 = vmul.f32 %v358_v49, %v143_v48  ;;  %vm150_vm4 = vweird.f32 %v358_v49 }
 0x141   :  { %vm151_vm6 = vmor %vm149_vm5, %vm150_vm4 }
 0x142   :  { %v146_v51 = vsub.f32 1.0, %v145_v50 }
 0x144   :  { %v147_v53 = vmul.f32 %v358_v49, %v146_v51 }
 0x146   :  { %v148_v55 = vadd.f32 %v358_v49, %v147_v53 }
 0x148   :  { %v152_v57 = vsel %vm151_vm6, %v358_v49, %v148_v55 }
 0x149   :  { %v157_v58 = vsel %vm154_vm7, %v156_v56, %v152_v57 }
 0x14a   :  { %v159_v59 = vmul.f32 %v157_v58, %v138_v45 }
 0x14c   :  { %250 = vmatmul.f32.vlgmr.msra.gmra.mxu1 %v159_v59  ;;  %270 = vmatmul.f32.vlgmr.msra.gmra.mxu2 %v159_v59 }
 0x14d   :  { %290 = vmatmul.f32.vlgmr.msra.gmra.mxu3 %v159_v59  ;;  %310 = vmatmul.f32.vlgmr.msrb.gmra.mxu0 %v159_v59 }
 0x1c9   :  { %v251_v63 = vpop.f32.mrf.mxu1 }
 0x1ca   :  { %v252_v0 = vadd.f32 %v251_v63, %v226_v61  ;;  %v311_v1 = vpop.f32.mrf.mxu0 }
 0x1cb   :  { %v312_v2 = vadd.f32 %v311_v1, %v229_v62 }
 0x1cc   :  { %314 = vst [vmem:[#allocation7] sm:$0xff] %v252_v0 }
 0x1cd   :  { %317 = vst [vmem:[#allocation7 + $0x18] sm:$0xff] %v312_v2 }
 0x1cf   :  { %v271_v5 = vpop.f32.mrf.mxu2 }
 0x1d0   :  { %v272_v6 = vadd.f32 %v271_v5, %v227_v3  ;;  %v291_v7 = vpop.f32.mrf.mxu3 }
 0x1d1   :  { %v292_v8 = vadd.f32 %v291_v7, %v228_v4 }
 0x1d2   :  { %315 = vst [vmem:[#allocation7 + $0x8] sm:$0xff] %v272_v6 }
 0x1d3   :  { %316 = vst [vmem:[#allocation7 + $0x10] sm:$0xff] %v292_v8 }
 0x1d4   :  { %328 = dma.vmem_to_hbm [thread:$0]  %s324_s20, 512, %s326_s23, [#allocation4]  }
 0x1d5   :  { %435 = dma.done.wait [#allocation4], 512  }
 0x1d6   :  { %436 = vsyncadd [#allocation4], 4294966784 }
 0x1d7   :  { %333 = vsyncpa [#allocation3], 1 }
 0x1d8   :  { %334 = vsyncpa [#allocation6], 1 }
 0x1d9   :  { %335 = vsyncpa [#allocation4], 1 }

// kernel: tpu_custom_call.1
= control target key start
LH: loop header
LB: loop body
LE: loop exit
PB: predicated region body
PF: predicated region fallthrough
CT: control target
= control target key end

     0   :  { %12 = vsyncpa [#allocation3], 0  ;;  %s510_s0 = inlined_call_operand.vmem [shape: f32[8,2], index: 0, kind: input, shape index: {}]   ;;  %s511_s1 = inlined_call_operand.vmem [shape: f32[2,128], index: 1, kind: input, shape index: {}]   ;;  %s512_s2 = inlined_call_operand.vmem [shape: f32[1,128], index: 2, kind: input, shape index: {}]   ;;  %s513_s3 = inlined_call_operand.hbm [shape: f32[128,128], index: 3, kind: input, shape index: {}]   ;;  %s514_s4 = inlined_call_operand.vmem [shape: f32[1,128], index: 4, kind: input, shape index: {}]   ;;  %s515_s5 = inlined_call_operand.hbm [shape: f32[128,512], index: 5, kind: input, shape index: {}]   ;;  %s516_s6 = inlined_call_operand.vmem [shape: f32[1,512], index: 6, kind: input, shape index: {}]   ;;  %s517_s7 = inlined_call_operand.hbm [shape: f32[8,512], index: 7, kind: output, shape index: {}]  }
   0x1   :  { %13 = vsyncpa [#allocation6], 0 }
   0x2   :  { %14 = vsyncpa [#allocation4], 0  ;;  %s25_s26 = sshll.u32 %s513_s3, 4  ;;  %s437_s27 = smov [#allocation2]   ;;  %s26_s26 = int_to_ptr.hbm [resolvable:$true] %s25_s26 }
   0x3   :  { %s27_s28 = sshll.u32 %s437_s27, 4  ;;  %s40_s8 = sshll.u32 %s515_s5, 4  ;;  %s28_s28 = int_to_ptr.vmem [resolvable:$true] %s27_s28  ;;  %s41_s8 = int_to_ptr.hbm [resolvable:$true] %s40_s8 }
   0x4   :  { %s438_s9 = smov 128   ;;  %s439_s10 = smov 8  }
   0x5   :  { %33 = dma.hbm_to_vmem [thread:$0]  %s26_s26, 2048, %s28_s28, [#allocation3], %s438_s9, %s438_s9, %s439_s10  }
   0x6   :  { %s440_s11 = smov [#allocation5]   ;;  %s441_s13 = smov 512  }
   0x7   :  { %s42_s12 = sshll.u32 %s440_s11, 4  ;;  %s442_s14 = smov 32   ;;  %s43_s12 = int_to_ptr.vmem [resolvable:$true] %s42_s12 }
   0x8   :  { %48 = dma.hbm_to_vmem [thread:$0]  %s41_s8, 8192, %s43_s12, [#allocation6], %s441_s13, %s441_s13, %s442_s14  }
   0x9   :  { %431 = dma.done.wait [#allocation3], 2048  }
   0xa   :  { %432 = vsyncadd [#allocation3], 4294965248 }
   0xb   :  { %433 = dma.done.wait [#allocation6], 8192  }
   0xc   :  { %434 = vsyncadd [#allocation6], 4294959104  ;;  %v443_v0 = vmov 0   ;;  %v59_v1 = vld [vmem:[%s510_s0] sm:$0xff]  ;;  %v444_v2 = vmov 1   ;;  %v115_v3 = vld [vmem:[#allocation2 + $0x78] sm:$0xff] }
   0xd   :  { %347 = vset.pattern.permute.xlu0 %v443_v0  ;;  %v114_v4 = vld [vmem:[#allocation2 + $0x70] sm:$0xff]  ;;  %120 = vmatpush.msra.mxu0 %v115_v3  ;;  %v113_v5 = vld [vmem:[#allocation2 + $0x68] sm:$0xff]  ;;  %v112_v6 = vld [vmem:[#allocation2 + $0x60] sm:$0xff]  ;;  %s445_s19 = smov [#allocation7]   ;;  %s325_s23 = sshll.u32 %s517_s7, 4  ;;  %s326_s23 = int_to_ptr.hbm [resolvable:$true] %s325_s23 }
   0xe   :  { %63 = vperm.xlu0 %347, %v59_v1   ;;  %v111_v7 = vld [vmem:[#allocation2 + $0x58] sm:$0xff]  ;;  %v110_v8 = vld [vmem:[#allocation2 + $0x50] sm:$0xff]  ;;  %v109_v9 = vld [vmem:[#allocation2 + $0x48] sm:$0xff]  ;;  %s323_s20 = sshll.u32 %s445_s19, 4  ;;  %s324_s20 = int_to_ptr.vmem [resolvable:$true] %s323_s20 }
   0xf   :  { %121 = vmatpush.msra.mxu0 %v114_v4  ;;  %v108_v10 = vld [vmem:[#allocation2 + $0x40] sm:$0xff]  ;;  %v107_v11 = vld [vmem:[#allocation2 + $0x38] sm:$0xff]  ;;  %v106_v12 = vld [vmem:[#allocation2 + $0x30] sm:$0xff] }
  0x10   :  { %v105_v13 = vld [vmem:[#allocation2 + $0x28] sm:$0xff]  ;;  %v104_v15 = vld [vmem:[#allocation2 + $0x20] sm:$0xff]  ;;  %v103_v16 = vld [vmem:[#allocation2 + $0x18] sm:$0xff] }
  0x11   :  { %122 = vmatpush.msra.mxu0 %v113_v5  ;;  %v60_v17 = vld [vmem:[%s511_s1] sm:$0x3]  ;;  %v102_v18 = vld [vmem:[#allocation2 + $0x10] sm:$0xff]  ;;  %v101_v21 = vld [vmem:[#allocation2 + $0x8] sm:$0xff] }
  0x12   :  { %v66_v19 = vperm.slane %v60_v17, 0  ;;  %v72_v20 = vperm.slane %v60_v17, 1  ;;  %v100_v22 = vld [vmem:[#allocation2] sm:$0xff]  ;;  %v221_v44 = vld [vmem:[#allocation5 + $0x1e8] sm:$0xff]  ;;  %v222_v45 = vld [vmem:[#allocation5 + $0x1f0] sm:$0xff] }
  0x13   :  { %123 = vmatpush.msra.mxu0 %v112_v6  ;;  %v349_v26 = vld [vmem:[%s512_s2] ss:$0 sm:$0xff]  ;;  %254 = vmatpush.msra.mxu2 %v221_v44  ;;  %v223_v46 = vld [vmem:[#allocation5 + $0x1f8] sm:$0xff]  ;;  %v217_v48 = vld [vmem:[#allocation5 + $0x1c8] sm:$0xff] }
  0x14   :  { %v220_v43 = vld [vmem:[#allocation5 + $0x1e0] sm:$0xff]  ;;  %274 = vmatpush.msra.mxu3 %v222_v45  ;;  %v218_v49 = vld [vmem:[#allocation5 + $0x1d0] sm:$0xff]  ;;  %v219_v50 = vld [vmem:[#allocation5 + $0x1d8] sm:$0xff] }
  0x15   :  { %124 = vmatpush.msra.mxu0 %v111_v7  ;;  %234 = vmatpush.msra.mxu1 %v220_v43  ;;  %v216_v47 = vld [vmem:[#allocation5 + $0x1c0] sm:$0xff]  ;;  %v213_v52 = vld [vmem:[#allocation5 + $0x1a8] sm:$0xff]  ;;  %v214_v53 = vld [vmem:[#allocation5 + $0x1b0] sm:$0xff] }
  0x16   :  { %348 = vset.pattern.permute.xlu0 %v444_v2  ;;  %255 = vmatpush.msra.mxu2 %v217_v48  ;;  %v212_v51 = vld [vmem:[#allocation5 + $0x1a0] sm:$0xff]  ;;  %v215_v54 = vld [vmem:[#allocation5 + $0x1b8] sm:$0xff]  ;;  %v209_v56 = vld [vmem:[#allocation5 + $0x188] sm:$0xff] }
  0x17   :  { %69 = vperm.xlu0 %348, %v59_v1   ;;  %125 = vmatpush.msra.mxu0 %v110_v8  ;;  %v208_v55 = vld [vmem:[#allocation5 + $0x180] sm:$0xff]  ;;  %v210_v57 = vld [vmem:[#allocation5 + $0x190] sm:$0xff]  ;;  %v211_v58 = vld [vmem:[#allocation5 + $0x198] sm:$0xff] }
  0x18   :  { %235 = vmatpush.msra.mxu1 %v216_v47  ;;  %275 = vmatpush.msra.mxu3 %v218_v49  ;;  %v204_v59 = vld [vmem:[#allocation5 + $0x160] sm:$0xff]  ;;  %v205_v60 = vld [vmem:[#allocation5 + $0x168] sm:$0xff]  ;;  %v206_v61 = vld [vmem:[#allocation5 + $0x170] sm:$0xff] }
  0x19   :  { %126 = vmatpush.msra.mxu0 %v109_v9  ;;  %256 = vmatpush.msra.mxu2 %v213_v52  ;;  %v207_v62 = vld [vmem:[#allocation5 + $0x178] sm:$0xff]  ;;  %v200_v63 = vld [vmem:[#allocation5 + $0x140] sm:$0xff]  ;;  %v201_v0 = vld [vmem:[#allocation5 + $0x148] sm:$0xff] }
  0x1a   :  { %236 = vmatpush.msra.mxu1 %v212_v51  ;;  %276 = vmatpush.msra.mxu3 %v214_v53  ;;  %v202_v1 = vld [vmem:[#allocation5 + $0x150] sm:$0xff]  ;;  %v203_v2 = vld [vmem:[#allocation5 + $0x158] sm:$0xff]  ;;  %v196_v3 = vld [vmem:[#allocation5 + $0x120] sm:$0xff] }
  0x1b   :  { %127 = vmatpush.msra.mxu0 %v108_v10  ;;  %257 = vmatpush.msra.mxu2 %v209_v56  ;;  %v197_v4 = vld [vmem:[#allocation5 + $0x128] sm:$0xff]  ;;  %v198_v5 = vld [vmem:[#allocation5 + $0x130] sm:$0xff]  ;;  %v199_v6 = vld [vmem:[#allocation5 + $0x138] sm:$0xff] }
  0x1c   :  { %237 = vmatpush.msra.mxu1 %v208_v55  ;;  %277 = vmatpush.msra.mxu3 %v210_v57  ;;  %v192_v7 = vld [vmem:[#allocation5 + $0x100] sm:$0xff]  ;;  %v193_v8 = vld [vmem:[#allocation5 + $0x108] sm:$0xff]  ;;  %v194_v9 = vld [vmem:[#allocation5 + $0x110] sm:$0xff] }
  0x1d   :  { %128 = vmatpush.msra.mxu0 %v107_v11  ;;  %258 = vmatpush.msra.mxu2 %v205_v60  ;;  %v195_v10 = vld [vmem:[#allocation5 + $0x118] sm:$0xff]  ;;  %v188_v11 = vld [vmem:[#allocation5 + $0xe0] sm:$0xff]  ;;  %v186_v17 = vld [vmem:[#allocation5 + $0xd0] sm:$0xff] }
  0x1e   :  { %238 = vmatpush.msra.mxu1 %v204_v59  ;;  %278 = vmatpush.msra.mxu3 %v206_v61  ;;  %v163_v44 = vld [vmem:[#allocation5 + $0x18] sm:$0xff]  ;;  %v224_v60 = vld [vmem:[%s516_s6] sm:$0xf] }
  0x1f   :  { %129 = vmatpush.msra.mxu0 %v106_v12  ;;  %259 = vmatpush.msra.mxu2 %v201_v0  ;;  %v189_v12 = vld [vmem:[#allocation5 + $0xe8] sm:$0xff]  ;;  %v226_v61 = vperm.slane %v224_v60, 0 }
  0x20   :  { %239 = vmatpush.msra.mxu1 %v200_v63  ;;  %279 = vmatpush.msra.mxu3 %v202_v1 }
  0x21   :  { %130 = vmatpush.msra.mxu0 %v105_v13  ;;  %260 = vmatpush.msra.mxu2 %v197_v4  ;;  %v190_v13 = vld [vmem:[#allocation5 + $0xf0] sm:$0xff]  ;;  %v228_v4 = vperm.slane %v224_v60, 2 }
  0x22   :  { %240 = vmatpush.msra.mxu1 %v196_v3  ;;  %280 = vmatpush.msra.mxu3 %v198_v5  ;;  %v227_v3 = vperm.slane %v224_v60, 1 }
  0x23   :  { %131 = vmatpush.msra.mxu0 %v104_v15  ;;  %261 = vmatpush.msra.mxu2 %v193_v8  ;;  %v184_v15 = vld [vmem:[#allocation5 + $0xc0] sm:$0xff] }
  0x24   :  { %241 = vmatpush.msra.mxu1 %v192_v7  ;;  %281 = vmatpush.msra.mxu3 %v194_v9 }
  0x25   :  { %132 = vmatpush.msra.mxu0 %v103_v16  ;;  %262 = vmatpush.msra.mxu2 %v189_v12  ;;  %v185_v16 = vld [vmem:[#allocation5 + $0xc8] sm:$0xff] }
  0x26   :  { %242 = vmatpush.msra.mxu1 %v188_v11  ;;  %282 = vmatpush.msra.mxu3 %v190_v13 }
  0x27   :  { %133 = vmatpush.msra.mxu0 %v102_v18  ;;  %263 = vmatpush.msra.mxu2 %v185_v16  ;;  %v187_v18 = vld [vmem:[#allocation5 + $0xd8] sm:$0xff] }
  0x28   :  { %243 = vmatpush.msra.mxu1 %v184_v15  ;;  %283 = vmatpush.msra.mxu3 %v186_v17 }
  0x29   :  { %134 = vmatpush.msra.mxu0 %v101_v21  ;;  %v182_v21 = vld [vmem:[#allocation5 + $0xb0] sm:$0xff] }
  0x2a   :  { %284 = vmatpush.msra.mxu3 %v182_v21 }
  0x2b   :  { %135 = vmatpush.msra.mxu0 %v100_v22  ;;  %v183_v22 = vld [vmem:[#allocation5 + $0xb8] sm:$0xff] }
  0x2d   :  { %294 = vmatpush.msrb.mxu0 %v223_v46 }
  0x2f   :  { %295 = vmatpush.msrb.mxu0 %v219_v50 }
  0x31   :  { %296 = vmatpush.msrb.mxu0 %v215_v54 }
  0x33   :  { %297 = vmatpush.msrb.mxu0 %v211_v58 }
  0x35   :  { %298 = vmatpush.msrb.mxu0 %v207_v62  ;;  %v229_v62 = vperm.slane %v224_v60, 3 }
  0x37   :  { %299 = vmatpush.msrb.mxu0 %v203_v2 }
  0x39   :  { %300 = vmatpush.msrb.mxu0 %v199_v6 }
  0x3b   :  { %301 = vmatpush.msrb.mxu0 %v195_v10 }
  0x80   :  { %v64_v14 = vpop.permute.xlu0 %63 }
  0x81   :  { %v67_v24 = vmul.f32 %v66_v19, %v64_v14  ;;  %v191_v14 = vld [vmem:[#allocation5 + $0xf8] sm:$0xff]  ;;  %v180_v19 = vld [vmem:[#allocation5 + $0xa0] sm:$0xff] }
  0x82   :  { %302 = vmatpush.msrb.mxu0 %v191_v14  ;;  %244 = vmatpush.msra.mxu1 %v180_v19 }
  0x84   :  { %303 = vmatpush.msrb.mxu0 %v187_v18 }
  0x86   :  { %304 = vmatpush.msrb.mxu0 %v183_v22 }
  0x89   :  { %v70_v23 = vpop.permute.xlu0 %69 }
  0x8a   :  { %v73_v25 = vmul.f32 %v72_v20, %v70_v23  ;;  %v181_v20 = vld [vmem:[#allocation5 + $0xa8] sm:$0xff]  ;;  %v176_v23 = vld [vmem:[#allocation5 + $0x80] sm:$0xff] }
  0x8b   :  { %264 = vmatpush.msra.mxu2 %v181_v20  ;;  %245 = vmatpush.msra.mxu1 %v176_v23 }
  0x8c   :  { %v74_v27 = vadd.f32 %v73_v25, %v67_v24  ;;  %v177_v24 = vld [vmem:[#allocation5 + $0x88] sm:$0xff]  ;;  %v178_v25 = vld [vmem:[#allocation5 + $0x90] sm:$0xff] }
  0x8d   :  { %265 = vmatpush.msra.mxu2 %v177_v24  ;;  %285 = vmatpush.msra.mxu3 %v178_v25 }
  0x8e   :  { %v79_v28 = vadd.f32 %v349_v26, %v74_v27  ;;  %v179_v26 = vld [vmem:[#allocation5 + $0x98] sm:$0xff]  ;;  %v172_v27 = vld [vmem:[#allocation5 + $0x60] sm:$0xff] }
  0x8f   :  { %305 = vmatpush.msrb.mxu0 %v179_v26  ;;  %246 = vmatpush.msra.mxu1 %v172_v27 }
  0x90   :  { %v336_v29 = vmul.f32 -1.442695, %v79_v28 }
  0x92   :  { %351 = vpow2.f32 %v336_v29  ;;  %v174_v29 = vld [vmem:[#allocation5 + $0x70] sm:$0xff] }
  0x93   :  { %286 = vmatpush.msra.mxu3 %v174_v29 }
  0x98   :  { %v352_v30 = vpop.eup %351 }
  0x99   :  { %v83_v31 = vadd.f32 1.0, %v352_v30  ;;  %v175_v30 = vld [vmem:[#allocation5 + $0x78] sm:$0xff] }
  0x9a   :  { %306 = vmatpush.msrb.mxu0 %v175_v30 }
  0x9b   :  { %353 = vrcp.f32 %v83_v31  ;;  %v95_v35 = vand.u32 2147483648, %v83_v31  ;;  %v93_v37 = vand.u32 2147483647, %v83_v31  ;;  %vm89_vm1 = vweird.f32 %v83_v31 }
  0x9d   :  { %v96_v39 = vor.u32 1.1754944e-38, %v95_v35  ;;  %vm94_vm3 = vcmp.eq.f32.partialorder %v93_v37, 8.507059e+37  ;;  %v171_v35 = vld [vmem:[#allocation5 + $0x58] sm:$0xff]  ;;  %v165_v37 = vld [vmem:[#allocation5 + $0x28] sm:$0xff] }
  0x9e   :  { %307 = vmatpush.msrb.mxu0 %v171_v35 }
  0xa1   :  { %v354_v32 = vpop.eup %353 }
  0xa2   :  { %v85_v33 = vmul.f32 %v354_v32, %v83_v31  ;;  %vm90_vm0 = vweird.f32 %v354_v32  ;;  %v168_v31 = vld [vmem:[#allocation5 + $0x40] sm:$0xff] }
  0xa3   :  { %vm91_vm2 = vmor %vm89_vm1, %vm90_vm0  ;;  %247 = vmatpush.msra.mxu1 %v168_v31 }
  0xa4   :  { %v86_v34 = vsub.f32 1.0, %v85_v33  ;;  %v170_v33 = vld [vmem:[#allocation5 + $0x50] sm:$0xff] }
  0xa5   :  { %287 = vmatpush.msra.mxu3 %v170_v33 }
  0xa6   :  { %v87_v36 = vmul.f32 %v354_v32, %v86_v34  ;;  %v350_v34 = vld [vmem:[%s514_s4] ss:$0 sm:$0xff] }
  0xa8   :  { %v88_v38 = vadd.f32 %v354_v32, %v87_v36  ;;  %v164_v36 = vld [vmem:[#allocation5 + $0x20] sm:$0xff] }
  0xa9   :  { %248 = vmatpush.msra.mxu1 %v164_v36 }
  0xaa   :  { %v92_v40 = vsel %vm91_vm2, %v354_v32, %v88_v38  ;;  %v169_v32 = vld [vmem:[#allocation5 + $0x48] sm:$0xff]  ;;  %v166_v38 = vld [vmem:[#allocation5 + $0x30] sm:$0xff] }
  0xab   :  { %v97_v41 = vsel %vm94_vm3, %v96_v39, %v92_v40  ;;  %v167_v39 = vld [vmem:[#allocation5 + $0x38] sm:$0xff]  ;;  %288 = vmatpush.msra.mxu3 %v166_v38  ;;  %v160_v40 = vld [vmem:[#allocation5] sm:$0xff] }
  0xac   :  { %v99_v42 = vmul.f32 %v97_v41, %v79_v28  ;;  %v173_v28 = vld [vmem:[#allocation5 + $0x68] sm:$0xff]  ;;  %308 = vmatpush.msrb.mxu0 %v167_v39  ;;  %249 = vmatpush.msra.mxu1 %v160_v40 }
  0xad   :  { %266 = vmatpush.msra.mxu2 %v173_v28  ;;  %v161_v41 = vld [vmem:[#allocation5 + $0x8] sm:$0xff] }
  0xae   :  { %136 = vmatmul.f32.vlgmr.msra.gmra.mxu0 %v99_v42  ;;  %v162_v42 = vld [vmem:[#allocation5 + $0x10] sm:$0xff] }
  0xaf   :  { %267 = vmatpush.msra.mxu2 %v169_v32  ;;  %289 = vmatpush.msra.mxu3 %v162_v42 }
  0xb0   :  { %309 = vmatpush.msrb.mxu0 %v163_v44 }
  0xb1   :  { %268 = vmatpush.msra.mxu2 %v165_v37 }
  0xb3   :  { %269 = vmatpush.msra.mxu2 %v161_v41 }
 0x12b   :  { %v137_v43 = vpop.f32.mrf.mxu0 }
 0x12c   :  { %v138_v45 = vadd.f32 %v350_v34, %v137_v43 }
 0x12e   :  { %v337_v46 = vmul.f32 -1.442695, %v138_v45 }
 0x130   :  { %355 = vpow2.f32 %v337_v46 }
 0x136   :  { %v356_v47 = vpop.eup %355 }
 0x137   :  { %v143_v48 = vadd.f32 1.0, %v356_v47 }
 0x139   :  { %357 = vrcp.f32 %v143_v48  ;;  %v155_v52 = vand.u32 2147483648, %v143_v48  ;;  %v153_v54 = vand.u32 2147483647, %v143_v48  ;;  %vm149_vm5 = vweird.f32 %v143_v48 }
 0x13b   :  { %v156_v56 = vor.u32 1.1754944e-38, %v155_v52  ;;  %vm154_vm7 = vcmp.eq.f32.partialorder %v153_v54, 8.507059e+37 }
 0x13f   :  { %v358_v49 = vpop.eup %357 }
 0x140   :  { %v145_v50 = vmul.f32 %v358_v49, %v143_v48  ;;  %vm150_vm4 = vweird.f32 %v358_v49 }
 0x141   :  { %vm151_vm6 = vmor %vm149_vm5, %vm150_vm4 }
 0x142   :  { %v146_v51 = vsub.f32 1.0, %v145_v50 }
 0x144   :  { %v147_v53 = vmul.f32 %v358_v49, %v146_v51 }
 0x146   :  { %v148_v55 = vadd.f32 %v358_v49, %v147_v53 }
 0x148   :  { %v152_v57 = vsel %vm151_vm6, %v358_v49, %v148_v55 }
 0x149   :  { %v157_v58 = vsel %vm154_vm7, %v156_v56, %v152_v57 }
 0x14a   :  { %v159_v59 = vmul.f32 %v157_v58, %v138_v45 }
 0x14c   :  { %250 = vmatmul.f32.vlgmr.msra.gmra.mxu1 %v159_v59  ;;  %270 = vmatmul.f32.vlgmr.msra.gmra.mxu2 %v159_v59 }
 0x14d   :  { %290 = vmatmul.f32.vlgmr.msra.gmra.mxu3 %v159_v59  ;;  %310 = vmatmul.f32.vlgmr.msrb.gmra.mxu0 %v159_v59 }
 0x1c9   :  { %v251_v63 = vpop.f32.mrf.mxu1 }
 0x1ca   :  { %v252_v0 = vadd.f32 %v251_v63, %v226_v61  ;;  %v311_v1 = vpop.f32.mrf.mxu0 }
 0x1cb   :  { %v312_v2 = vadd.f32 %v311_v1, %v229_v62 }
 0x1cc   :  { %314 = vst [vmem:[#allocation7] sm:$0xff] %v252_v0 }
 0x1cd   :  { %317 = vst [vmem:[#allocation7 + $0x18] sm:$0xff] %v312_v2 }
 0x1cf   :  { %v271_v5 = vpop.f32.mrf.mxu2 }
 0x1d0   :  { %v272_v6 = vadd.f32 %v271_v5, %v227_v3  ;;  %v291_v7 = vpop.f32.mrf.mxu3 }
 0x1d1   :  { %v292_v8 = vadd.f32 %v291_v7, %v228_v4 }
 0x1d2   :  { %315 = vst [vmem:[#allocation7 + $0x8] sm:$0xff] %v272_v6 }
 0x1d3   :  { %316 = vst [vmem:[#allocation7 + $0x10] sm:$0xff] %v292_v8 }
 0x1d4   :  { %328 = dma.vmem_to_hbm [thread:$0]  %s324_s20, 512, %s326_s23, [#allocation4]  }
 0x1d5   :  { %435 = dma.done.wait [#allocation4], 512  }
 0x1d6   :  { %436 = vsyncadd [#allocation4], 4294966784 }
 0x1d7   :  { %333 = vsyncpa [#allocation3], 1 }
 0x1d8   :  { %334 = vsyncpa [#allocation6], 1 }
 0x1d9   :  { %335 = vsyncpa [#allocation4], 1 }

</bundles_post_ra>
